<compile_context>
chip_gen: v5e
topology: v5e:2x2
jax: 0.10.0
libtpu: 0.0.40
codegen_flags: <defaults>
</compile_context>

<pallas_src>
import functools

import jax
import jax.numpy as jnp
import numpy as np
from jax.experimental import pallas as pl
from jax.experimental.pallas import tpu as pltpu


def _sel_matrix(n_in, n_out):
    """(n_out, n_in) one-hot matrix S with S[o, src(o)] = 1 (PyTorch 'nearest')."""
    src = (np.arange(n_out) * n_in) // n_out
    s = np.zeros((n_out, n_in), dtype=np.float32)
    s[np.arange(n_out), src] = 1.0
    return s


def _sublane_tile(dtype):
    """Second-minor tile rows for a dtype: f32 -> 8, bf16 -> 16, int8/fp8 -> 32."""
    return {4: 8, 2: 16, 1: 32}.get(jnp.dtype(dtype).itemsize, 8)


def _vmem_config():
    """(live_vmem_budget_bytes, vmem_limit_bytes, min_grid_steps) per generation."""
    try:
        cap = pltpu.get_tpu_info().vmem_capacity_bytes
    except Exception:  # query unavailable -> be conservative (v7x-like)
        cap = 64 << 20
    if cap >= (100 << 20):               # v5e / v6e: 128 MiB physical VMEM
        return 44 << 20, 64 << 20, 4
    return 18 << 20, 48 << 20, 8          # v7x: 64 MiB physical VMEM


def _choose_h_blocks(n_batch, hin, sub, live_bytes, live_budget, min_steps):
    """Largest H block (in low-res input rows) that fits the VMEM budget while
    giving at least `min_steps` total grid steps when the shape allows it."""
    target = max(1, -(-min_steps // max(n_batch, 1)))
    best = (1, hin)
    for n_hb in range(1, hin + 1):        # ascending -> first fit is largest block
        if hin % n_hb:
            continue
        hb = hin // n_hb
        if hb % sub and hb != hin:        # keep blocks sublane-tile aligned
            continue
        best = (n_hb, hb)
        if live_bytes(hb) <= live_budget and n_hb >= target:
            return best
    return best


def _up_and_cat_folded_kernel(x_ref, skip_ref, gw_ref, o_ref, *,
                              cx, sh, flatten, precision):
    """Integer-H-scale fast path.

    x_ref:    (1, Cx, Hb, Win)          low-res input rows for this block
    skip_ref: (1, Cs, Hb, sh*Wout)      skip, H-folded (free wrapper reshape)
    gw_ref:   (Win, Wout)               one-hot nearest-W selection matrix
    o_ref:    (1, Cx+Cs, Hb, sh*Wout)   output, H-folded
    """
    gw = gw_ref[...]
    wout = gw.shape[1]
    xv = x_ref[0]                                             # (Cx, Hb, Win)
    cxb, hb, win = xv.shape

    if flatten:
        # Single MXU dot across all channels: M = Cx*Hb, K = Win, N = Wout.
        tw = jnp.dot(xv.reshape(cxb * hb, win), gw,
                     preferred_element_type=jnp.float32,
                     precision=precision).astype(o_ref.dtype)
        # H replication off the MXU: lane-axis tiling (VPU/vector-move work),
        # then a layout-trivial sublane split (hb is sublane-tile aligned here).
        up = tw if sh == 1 else jnp.concatenate([tw] * sh, axis=-1)
        o_ref[0, :cx] = up.reshape(cxb, hb, sh * wout)
    else:
        # Tiny / unaligned Hb (only hit by very small images): per-channel dots.
        for ci in range(cx):
            twc = jnp.dot(xv[ci], gw, preferred_element_type=jnp.float32,
                          precision=precision).astype(o_ref.dtype)
            o_ref[0, ci] = twc if sh == 1 else jnp.concatenate([twc] * sh,
                                                               axis=-1)

    # Skip pass-through into the trailing channels: one unmasked block store.
    o_ref[0, cx:] = skip_ref[0].astype(o_ref.dtype)


def _up_and_cat_generic_kernel(x_ref, skip_ref, gh_ref, gw_ref, o_ref, *,
                               cx, precision):
    """Non-integer H ratio fallback: exact one-hot Gh @ x_c @ Gw per channel.

    x_ref:    (1, Cx, Hin, Win)
    skip_ref: (1, Cs, Hout, Wout)
    gh_ref:   (Hout, Hin)
    gw_ref:   (Win, Wout)
    o_ref:    (1, Cx+Cs, Hout, Wout)
    """
    gh = gh_ref[...]
    gw = gw_ref[...]
    o_ref[0, cx:] = skip_ref[0].astype(o_ref.dtype)
    # TODO(synk): rare path (non-integer H scale from nn.Upsample(size=...));
    # per-channel small-K dots and a single full-H block are acceptable here.
    for c in range(cx):
        th = jnp.dot(gh, x_ref[0, c], preferred_element_type=jnp.float32,
                     precision=precision).astype(gw.dtype)
        up = jnp.dot(th, gw, preferred_element_type=jnp.float32,
                     precision=precision)
        o_ref[0, c] = up.astype(o_ref.dtype)


def up_and_cat(x, skip):
    """x: (N, Cx, Hin, Win), skip: (N, Cs, Hout, Wout) -> (N, Cx+Cs, Hout, Wout).

    Equivalent to: cat(Upsample(size=skip.shape[-2:], mode='nearest')(x), skip, dim=1).
    """
    n, cx, hin, win = x.shape
    ns, cs, hout, wout = skip.shape
    assert n == ns, "batch size mismatch"

    out_dtype = jnp.result_type(x.dtype, skip.dtype)
    itemsize = jnp.dtype(out_dtype).itemsize
    precision = (jax.lax.Precision.HIGHEST
                 if jnp.dtype(x.dtype) == jnp.dtype(jnp.float32)
                 else jax.lax.Precision.DEFAULT)
    live_budget, vmem_limit, min_steps = _vmem_config()
    sub = _sublane_tile(out_dtype)

    gw = jnp.asarray(_sel_matrix(win, wout).T, dtype=x.dtype)     # (Win, Wout)
    cparams = pltpu.CompilerParams(
        dimension_semantics=("parallel", "parallel"),
        vmem_limit_bytes=vmem_limit)

    if hout % hin == 0:
        # ---- Fast path: integer H scale, H-folded output layout. ----
        sh = hout // hin
        lane = sh * wout                                          # folded last dim

        def live_bytes(hb):
            io = (cx * hb * win + cs * hb * lane
                  + (cx + cs) * hb * lane + win * wout) * itemsize
            tmp = cx * hb * wout * 4 + cx * hb * (wout + lane) * itemsize
            return 2 * io + tmp          # 2x: Pallas double-buffers in/out blocks

        n_hb, hb = _choose_h_blocks(n, hin, sub, live_bytes, live_budget,
                                    min_steps)
        flatten = (hb % _sublane_tile(x.dtype) == 0)

        skip_f = skip.reshape(n, cs, hin, lane)                   # contiguous -> free
        kernel = functools.partial(_up_and_cat_folded_kernel, cx=cx, sh=sh,
                                   flatten=flatten, precision=precision)
        out_f = pl.pallas_call(
            kernel,
            out_shape=jax.ShapeDtypeStruct((n, cx + cs, hin, lane), out_dtype),
            grid=(n, n_hb),
            in_specs=[
                pl.BlockSpec((1, cx, hb, win), lambda b, h: (b, 0, h, 0)),
                pl.BlockSpec((1, cs, hb, lane), lambda b, h: (b, 0, h, 0)),
                pl.BlockSpec((win, wout), lambda b, h: (0, 0)),
            ],
            out_specs=pl.BlockSpec((1, cx + cs, hb, lane),
                                   lambda b, h: (b, 0, h, 0)),
            compiler_params=cparams,
        )(x, skip_f, gw)
        return out_f.reshape(n, cx + cs, hout, wout)              # contiguous -> free

    # ---- Fallback: non-integer H ratio, single full-H block. ----
    gh = jnp.asarray(_sel_matrix(hin, hout), dtype=x.dtype)       # (Hout, Hin)
    kernel = functools.partial(_up_and_cat_generic_kernel, cx=cx,
                               precision=precision)
    return pl.pallas_call(
        kernel,
        out_shape=jax.ShapeDtypeStruct((n, cx + cs, hout, wout), out_dtype),
        grid=(n, 1),
        in_specs=[
            pl.BlockSpec((1, cx, hin, win), lambda b, h: (b, 0, 0, 0)),
            pl.BlockSpec((1, cs, hout, wout), lambda b, h: (b, 0, 0, 0)),
            pl.BlockSpec((hout, hin), lambda b, h: (0, 0)),
            pl.BlockSpec((win, wout), lambda b, h: (0, 0)),
        ],
        out_specs=pl.BlockSpec((1, cx + cs, hout, wout),
                               lambda b, h: (b, 0, 0, 0)),
        compiler_params=cparams,
    )(x, skip, gh, gw)


def _reference(x, skip):
    _, _, hin, win = x.shape
    _, _, hout, wout = skip.shape
    h_src = (np.arange(hout) * hin) // hout
    w_src = (np.arange(wout) * win) // wout
    x_up = x[:, :, h_src, :][:, :, :, w_src]
    return jnp.concatenate((x_up, skip), axis=1)


if __name__ == "__main__":
    keys = jax.random.split(jax.random.PRNGKey(0), 8)

    # Case 1: classic UNet decoder step -- 2x nearest upsample, then concat.
    x1 = jax.random.normal(keys[0], (2, 4, 8, 8), dtype=jnp.float32)
    s1 = jax.random.normal(keys[1], (2, 3, 16, 16), dtype=jnp.float32)
    o1 = up_and_cat(x1, s1)
    jax.block_until_ready(o1)
    assert o1.shape == (2, 7, 16, 16), o1.shape
    np.testing.assert_allclose(np.asarray(o1), np.asarray(_reference(x1, s1)),
                               rtol=1e-6, atol=1e-6)

    # Case 2: anisotropic integer scale (4x along H, 2x along W).
    x2 = jax.random.normal(keys[2], (1, 3, 8, 8), dtype=jnp.float32)
    s2 = jax.random.normal(keys[3], (1, 5, 32, 16), dtype=jnp.float32)
    o2 = up_and_cat(x2, s2)
    jax.block_until_ready(o2)
    assert o2.shape == (1, 8, 32, 16), o2.shape
    np.testing.assert_allclose(np.asarray(o2), np.asarray(_reference(x2, s2)),
                               rtol=1e-6, atol=1e-6)

    # Case 3: bf16 inputs (exact pass-through expected).
    x3 = jax.random.normal(keys[4], (1, 4, 16, 16), dtype=jnp.bfloat16)
    s3 = jax.random.normal(keys[5], (1, 4, 32, 32), dtype=jnp.bfloat16)
    o3 = up_and_cat(x3, s3)
    jax.block_until_ready(o3)
    assert o3.shape == (1, 8, 32, 32), o3.shape
    np.testing.assert_allclose(np.asarray(o3).astype(np.float32),
                               np.asarray(_reference(x3, s3)).astype(np.float32),
                               rtol=1e-6, atol=1e-6)

    # Case 4: non-integer H ratio -> generic one-hot fallback kernel.
    x4 = jax.random.normal(keys[6], (1, 2, 6, 8), dtype=jnp.float32)
    s4 = jax.random.normal(keys[7], (1, 2, 16, 16), dtype=jnp.float32)
    o4 = up_and_cat(x4, s4)
    jax.block_until_ready(o4)
    assert o4.shape == (1, 4, 16, 16), o4.shape
    np.testing.assert_allclose(np.asarray(o4), np.asarray(_reference(x4, s4)),
                               rtol=1e-6, atol=1e-6)

    print("KERNEL_OK")
</pallas_src>

<mosaic_0001>
module attributes {stable_mosaic.version = 11 : i64} {
  func.func @_up_and_cat_folded_kernel(%arg0: i32, %arg1: i32, %arg2: memref<1x4x8x8xf32, #tpu.memory_space<vmem>>, %arg3: memref<1x3x8x32xf32, #tpu.memory_space<vmem>>, %arg4: memref<8x16xf32, #tpu.memory_space<vmem>>, %arg5: memref<1x7x8x32xf32, #tpu.memory_space<vmem>>) attributes {dimension_semantics = [#tpu.dimension_semantics<parallel>, #tpu.dimension_semantics<parallel>], iteration_bounds = array<i64: 2, 1>, scalar_prefetch = 0 : i64, scratch_operands = 0 : i64, tpu.core_type = #tpu.core_type<tc>, window_params = [{transform_indices = @transform_0, window_bounds = array<i64: 1, 4, 8, 8>}, {transform_indices = @transform_1, window_bounds = array<i64: 1, 3, 8, 32>}, {pipeline_mode = #tpu.pipeline_mode<synchronous>, transform_indices = @transform_2, window_bounds = array<i64: 8, 16>}, {transform_indices = @transform_3, window_bounds = array<i64: 1, 7, 8, 32>}]} {
    %c0 = arith.constant 0 : index
    %c0_0 = arith.constant 0 : index
    %0 = vector.load %arg4[%c0, %c0_0] : memref<8x16xf32, #tpu.memory_space<vmem>>, vector<8x16xf32>
    %c0_1 = arith.constant 0 : index
    %c0_2 = arith.constant 0 : index
    %c0_3 = arith.constant 0 : index
    %c0_4 = arith.constant 0 : index
    %1 = vector.load %arg2[%c0_1, %c0_2, %c0_3, %c0_4] : memref<1x4x8x8xf32, #tpu.memory_space<vmem>>, vector<1x4x8x8xf32>
    %2 = vector.shape_cast %1 : vector<1x4x8x8xf32> to vector<4x8x8xf32>
    %3 = vector.shape_cast %2 : vector<4x8x8xf32> to vector<32x8xf32>
    %cst = arith.constant dense<0.000000e+00> : vector<32x16xf32>
    %4 = tpu.matmul %3, %0, %cst {dimension_numbers = #tpu.dot_dimension_numbers<[1], [0], [0], [1], [0, 0, 1, 1], [], []>, precision = #tpu.contract_precision<fp32>} : vector<32x8xf32>, vector<8x16xf32>, vector<32x16xf32> -> vector<32x16xf32>
    %5 = tpu.concatenate %4, %4 in 1 : vector<32x16xf32>, vector<32x16xf32> -> vector<32x32xf32>
    %6 = vector.shape_cast %5 : vector<32x32xf32> to vector<4x8x32xf32>
    %c0_5 = arith.constant 0 : index
    %c0_6 = arith.constant 0 : index
    %c0_7 = arith.constant 0 : index
    %c0_8 = arith.constant 0 : index
    %7 = vector.load %arg5[%c0_5, %c0_6, %c0_7, %c0_8] : memref<1x7x8x32xf32, #tpu.memory_space<vmem>>, vector<1x4x8x32xf32>
    %8 = vector.shape_cast %7 : vector<1x4x8x32xf32> to vector<4x8x32xf32>
    %9 = vector.shape_cast %6 : vector<4x8x32xf32> to vector<1x4x8x32xf32>
    tpu.vector_store %arg5[%c0_5, %c0_6, %c0_7, %c0_8], %9 {strides = array<i32>} : memref<1x7x8x32xf32, #tpu.memory_space<vmem>>, vector<1x4x8x32xf32>,
    %c0_9 = arith.constant 0 : index
    %c0_10 = arith.constant 0 : index
    %c0_11 = arith.constant 0 : index
    %c0_12 = arith.constant 0 : index
    %10 = vector.load %arg3[%c0_9, %c0_10, %c0_11, %c0_12] : memref<1x3x8x32xf32, #tpu.memory_space<vmem>>, vector<1x3x8x32xf32>
    %11 = vector.shape_cast %10 : vector<1x3x8x32xf32> to vector<3x8x32xf32>
    %c0_13 = arith.constant 0 : index
    %c4 = arith.constant 4 : index
    %c0_14 = arith.constant 0 : index
    %c0_15 = arith.constant 0 : index
    %12 = vector.load %arg5[%c0_13, %c4, %c0_14, %c0_15] : memref<1x7x8x32xf32, #tpu.memory_space<vmem>>, vector<1x3x8x32xf32>
    %13 = vector.shape_cast %12 : vector<1x3x8x32xf32> to vector<3x8x32xf32>
    %14 = vector.shape_cast %11 : vector<3x8x32xf32> to vector<1x3x8x32xf32>
    tpu.vector_store %arg5[%c0_13, %c4, %c0_14, %c0_15], %14 {strides = array<i32>} : memref<1x7x8x32xf32, #tpu.memory_space<vmem>>, vector<1x3x8x32xf32>,
    return
  }
  func.func @transform_0(%arg0: i32, %arg1: i32) -> (i32, i32, i32, i32) {
    %c0_i32 = arith.constant 0 : i32
    %c0_i32_0 = arith.constant 0 : i32
    %c0_i32_1 = arith.constant 0 : i32
    return %arg0, %c0_i32, %arg1, %c0_i32_0 : i32, i32, i32, i32
  }
  func.func @transform_1(%arg0: i32, %arg1: i32) -> (i32, i32, i32, i32) {
    %c0_i32 = arith.constant 0 : i32
    %c0_i32_0 = arith.constant 0 : i32
    %c0_i32_1 = arith.constant 0 : i32
    return %arg0, %c0_i32, %arg1, %c0_i32_0 : i32, i32, i32, i32
  }
  func.func @transform_2(%arg0: i32, %arg1: i32) -> (i32, i32) {
    %c0_i32 = arith.constant 0 : i32
    %c0_i32_0 = arith.constant 0 : i32
    %c0_i32_1 = arith.constant 0 : i32
    return %c0_i32, %c0_i32_0 : i32, i32
  }
  func.func @transform_3(%arg0: i32, %arg1: i32) -> (i32, i32, i32, i32) {
    %c0_i32 = arith.constant 0 : i32
    %c0_i32_0 = arith.constant 0 : i32
    %c0_i32_1 = arith.constant 0 : i32
    return %arg0, %c0_i32, %arg1, %c0_i32_0 : i32, i32, i32, i32
  }
}

</mosaic_0001>

<bundles_post_ra>
// kernel: tpu_custom_call.1
= control target key start
LH: loop header
LB: loop body
LE: loop exit
PB: predicated region body
PF: predicated region fallthrough
CT: control target
= control target key end

     0   :  { %s1201_s0 = inlined_call_operand.hbm [shape: f32[2,4,8,8], index: 0, kind: input, shape index: {}]   ;;  %s1202_s1 = inlined_call_operand.hbm [shape: f32[2,3,8,32], index: 1, kind: input, shape index: {}]   ;;  %s1203_s2 = inlined_call_operand.hbm [shape: f32[8,16], index: 2, kind: input, shape index: {}]   ;;  %s1204_s3 = inlined_call_operand.hbm [shape: f32[2,7,8,32], index: 3, kind: output, shape index: {}]  }
   0x1   :  { %1208 = sst [smem:[#allocation16_spill]] %s1203_s2 }
   0x2   :  { %8 = vsyncpa [#allocation3], 0 }
   0x3   :  { %10 = vsyncpa [#allocation3 + $0x1], 0 }
   0x4   :  { %11 = vsyncpa [#allocation6], 0 }
   0x5   :  { %13 = vsyncpa [#allocation6 + $0x1], 0 }
   0x6   :  { %14 = vsyncpa [#allocation4], 0 }
   0x7   :  { %16 = vsyncpa [#allocation4 + $0x1], 0  ;;  %s1010_s12 = smov 0   ;;  %s1012_s13 = smov 0  }
   0x8   :  { %s1014_s14 = smov 0   ;;  %s1016_s15 = smov 0  }
   0x9   :  { %s1018_s16 = smov 0   ;;  %s1020_s17 = smov 0  }
   0xa LB: > { %1209 = sst [smem:[#allocation13_spill]] %s962_s12  ;;  %s1041_s18 = sadd.s32 4294967295, %s982_s17   ;;  %s982_s17 = sphi %s1020_s17, %s22_s17   ;;  %s978_s16 = sphi %s1018_s16, %s1226_s16   ;;  %s974_s15 = sphi %s1016_s15, %s1225_s15   ;;  %s970_s14 = sphi %s1014_s14, %s1224_s14   ;;  %s966_s13 = sphi %s1012_s13, %s1223_s13   ;;  %s962_s12 = sphi %s1010_s12, %s1222_s12  }
   0xb   : > { %s694_s19 = sadd.s32 4294967294, %s982_s17   ;;  %s43_s20 = sadd.s32 1, %s970_s14 }
   0xc   : > { %p50_p0 = scmp.ne.s32.totalorder %s970_s14, %s966_s13  ;;  %p51_p1 = scmp.eq.s32.totalorder %s982_s17, 0 }
   0xd   : > { %p56_p2 = scmp.ne.s32.totalorder %s966_s13, %s962_s12  ;;  %p57_p3 = scmp.eq.s32.totalorder %s1041_s18, 0 }
   0xe   : > { %p131_p4 = scmp.eq.s32.totalorder %s1041_s18, 1  ;;  %p1052_p5 = por %p51_p1, %p50_p0 }
   0xf   : > { %p137_p6 = scmp.eq.s32.totalorder %s694_s19, 1  ;;  %p1058_p7 = por %p57_p3, %p56_p2 }
  0x10   : > { %p1062_p8 = por %p131_p4, %p50_p0  ;;  %p695_p10 = scmp.ge.s32.totalorder %s982_s17, 1 }
  0x11   : > { %p1066_p9 = por %p137_p6, %p56_p2  ;;  %p144_p11 = scmp.lt.s32.totalorder %s982_s17, 3 }
  0x12   : > { %s1215_s2 = sld [smem:[#allocation16_spill]]  ;;  %s984_s29 = smov [#allocation7]  }
  0x13   : > { %s1213_s24 = scalar_select %p1066_p9, 1, 0 }
  0x14   : > { %p1075_p12 = pnand %p695_p10, %p144_p11  ;;  %s158_s30 = sshll.u32 %s984_s29, 4  ;;  %s159_s30 = int_to_ptr.vmem [resolvable:$true] %s158_s30 }
  0x15   : > { %1214 = sst [smem:[#allocation14_spill]] %s1213_s24  ;;  %p697_p13 = scmp.ge.s32.totalorder %s982_s17, 2 }
  0x16   : > { %p729_p0 = pneg %p1075_p12  ;;  %p745_p1 = scmp.lt.s32.totalorder %s982_s17, 2 }
  0x17   : > { %s34_s5 = sadd.s32 1, %s978_s16  ;;  %s169_s6 = sand.u32 1, %s970_s14  }
  0x18   : > { %s156_s27 = sshll.u32 %s1215_s2, 4  ;;  %p730_p2 = pnand %p729_p0, %p57_p3  ;;  %s157_s27 = int_to_ptr.hbm [resolvable:$true] %s156_s27 }
  0x19   : > { %p1087_p4 = pnand %p745_p1, %p1052_p5  ;;  %p36_p6 = scmp.ge.s32.totalorder %s34_s5, 2 }
  0x1a   : > { %732 = dma.hbm_to_vmem [thread:$0]  (!%p730_p2), %s157_s27, 128, %s159_s30, [#allocation6]  }
  0x1b   : > { %s1228_s5 = smov (%p36_p6, %s34_s5), 0  ;;  %s698_s7 = sshll.u32 %s169_s6, 5 }
  0x1c   : > { %1218 = sst [smem:[#allocation15_spill]] %s1228_s5  ;;  %s38_s8 = ssub.s32 %s978_s16, %s1228_s5 }
  0x1d   : > { %p41_p10 = scmp.eq.s32.totalorder %s38_s8, 0  ;;  %s711_s9 = sshll.u32 %s978_s16, 5 }
  0x1e   : > { %s179_s19 = scalar_lea.hbm %s1201_s0, %s711_s9  ;;  %s173_s21 = scalar_lea.vmem [#allocation2], %s698_s7 }
  0x1f   : > { %s182_s25 = sshll.u32 %s173_s21, 4  ;;  %s180_s27 = sshll.u32 %s179_s19, 4  ;;  %s183_s25 = int_to_ptr.vmem [resolvable:$true] %s182_s25  ;;  %s181_s27 = int_to_ptr.hbm [resolvable:$true] %s180_s27 }
  0x20   : > { %s1104_s26 = scalar_select %p41_p10, %s970_s14, %s43_s20  }
  0x21   : > { %s192_s29 = sand.u32 1, %s982_s17   ;;  %s170_s30 = scalar_lea.sflag [#allocation3], %s169_s6 }
  0x22   : > { %s985_s2 = smov 128   ;;  %s986_s5 = smov 8  }
  0x23   : > { %736 = dma.hbm_to_vmem [thread:$0]  (!%p1087_p4), %s181_s27, 512, %s183_s25, %s170_s30, %s985_s2, %s985_s2, %s986_s5  }
  0x24   : > { %s714_s8 = smul.u32 24, %s169_s6  ;;  %s193_s19 = scalar_lea.sflag [#allocation6], %s192_s29 }
  0x25   : > { %s715_s24 = smul.u32 24, %s978_s16  ;;  %s1118_s21 = sand.u32 (!%p1075_p12), 1, %s966_s13  }
  0x26   : > { %s196_s9 = scalar_lea.vmem [#allocation5], %s714_s8  ;;  %217 = sbr.rel (%p1075_p12) target bundleno = 363 (0x16b), region = 32 }
  0x27   : > { %s202_s7 = scalar_lea.hbm %s1202_s1, %s715_s24  ;;  %s205_s11 = sshll.u32 %s196_s9, 4  ;;  %s206_s11 = int_to_ptr.vmem [resolvable:$true] %s205_s11 }
  0x28   : > { %s203_s20 = sshll.u32 %s202_s7, 4  ;;  %s703_s6 = sshll.u32 (!%p1075_p12), %s1118_s21, 5  ;;  %s204_s20 = int_to_ptr.hbm [resolvable:$true] %s203_s20 }
  0x29   : > { %739 = dma.hbm_to_vmem [thread:$0]  (!%p1087_p4), %s204_s20, 384, %s206_s11, %s193_s19, %s985_s2, %s985_s2, %s986_s5  }
  0x2a   : > { %s220_s12 = scalar_lea.sflag (!%p1075_p12), [#allocation3], %s1118_s21  ;;  %s223_s24 = scalar_lea.vmem (!%p1075_p12), [#allocation2], %s703_s6 }
  0x2b   : > { %945 = dma.done.wait (%p1058_p7), %s220_s12, 512  }
  0x2c   : > { %947 = vsyncadd (%p1058_p7), %s220_s12, 4294966784  ;;  %s229_s2 = sand.u32 1, %s1041_s18   ;;  %s716_s28 = smul.u32 24, %s1118_s21 }
  0x2d   : > { %s230_s4 = scalar_lea.sflag [#allocation6], %s229_s2 }
  0x2e   : > { %s1128_s5 = scalar_lea.vmem [#allocation5], %s716_s28 }
  0x2f   : > { %949 = dma.done.wait (%p1058_p7), %s230_s4, 384  }
  0x30   : > { %951 = vsyncadd (%p1058_p7), %s230_s4, 4294966912 }
  0x31   : > { %953 = dma.done.wait (%p57_p3), [#allocation6], 128  }
  0x32   : > { %955 = vsyncadd (%p57_p3), [#allocation6], 4294967168  ;;  %vm272_vm0 = vcmask 64512   ;;  %v267_v0 = vld [vmem:[#allocation7] sm:$0xff]  ;;  %v271_v2 = vld [vmem:[%s223_s24 + $0x18] sm:$0xff]  ;;  %s717_s18 = smul.u32 56, %s1118_s21 }
  0x33   : > { %v270_v1 = vld [vmem:[%s223_s24 + $0x10] sm:$0xff]  ;;  %v300_v3 = vand.u32 4294901760, %v267_v0  ;;  %v283_v5 = vsel %vm272_vm0, %v271_v2, 0  ;;  %v268_v6 = vld [vmem:[%s223_s24] sm:$0xff]  ;;  %v269_v7 = vld [vmem:[%s223_s24 + $0x8] sm:$0xff]  ;;  %vm545_vm1 = vcmask 261120  }
  0x34   : > { %v280_v4 = vsel %vm272_vm0, %v270_v1, 0  ;;  %v326_v9 = vand.u32 4294901760, %v283_v5  ;;  %v274_v10 = vsel %vm272_vm0, %v268_v6, 0  ;;  %v277_v11 = vsel %vm272_vm0, %v269_v7, 0  ;;  %v550_v48 = vld [vmem:[%s1128_s5] sm:$0xff]  ;;  %v551_v49 = vld [vmem:[%s1128_s5 + $0x8] sm:$0xff] }
  0x35   : > { %v318_v8 = vand.u32 4294901760, %v280_v4  ;;  %712 = vmatpush.msra.mxu2 %v300_v3  ;;  %v351_v12 = vsub.f32 %v267_v0, %v300_v3  ;;  %301 = vmatpush.msra.mxu0 %v300_v3  ;;  %v302_v13 = vand.u32 4294901760, %v274_v10  ;;  %v310_v14 = vand.u32 4294901760, %v277_v11  ;;  %v552_v50 = vld [vmem:[%s1128_s5 + $0x10] sm:$0xff]  ;;  %s1142_s22 = scalar_lea.vmem [#allocation8], %s717_s18  ;;  %s987_s25 = smov 16  }
  0x36   : > { %v327_v16 = vsub.f32 %v283_v5, %v326_v9  ;;  %705 = vst.msk [vmem:[%s1142_s22 + $0x20] sm:$0xff] %vm545_vm1, %v550_v48  ;;  %vm540_vm2 = vcmask 130048   ;;  %s718_s27 = smul.u32 56, %s974_s15  ;;  %s571_s10 = sshll.u32 %s1142_s22, 4  ;;  %s572_s10 = int_to_ptr.vmem [resolvable:$true] %s571_s10 }
  0x37   : > { %v319_v15 = vsub.f32 %v280_v4, %v318_v8  ;;  %v352_v17 = vand.u32 4294901760, %v351_v12  ;;  %390 = vmatpush.msrb.mxu2 %v351_v12  ;;  %v303_v18 = vsub.f32 %v274_v10, %v302_v13  ;;  %v311_v19 = vsub.f32 %v277_v11, %v310_v14  ;;  %706 = vst.msk [vmem:[%s1142_s22 + $0x28] sm:$0xff] %vm545_vm1, %v551_v49  ;;  %s558_s15 = scalar_lea.sflag [#allocation4], %s1118_s21  ;;  %s912_s6 = scalar_lea.hbm %s1204_s3, 112 }
  0x38   : > { %v328_v24 = vand.u32 4294901760, %v327_v16  ;;  %707 = vst.msk [vmem:[%s1142_s22 + $0x30] sm:$0xff] %vm545_vm1, %v552_v50  ;;  %s570_s8 = scalar_lea.hbm %s1204_s3, %s718_s27 }
  0x39   : > { %v320_v20 = vand.u32 4294901760, %v319_v15  ;;  %v353_v21 = vsub.f32 %v351_v12, %v352_v17  ;;  %v304_v22 = vand.u32 4294901760, %v303_v18  ;;  %472 = vmatpush.msrb.mxu0 %v352_v17  ;;  %v312_v27 = vand.u32 4294901760, %v311_v19  ;;  %s573_s7 = sshll.u32 %s570_s8, 4  ;;  %s574_s7 = int_to_ptr.hbm [resolvable:$true] %s573_s7 }
  0x3a   : > { %v329_v30 = vsub.f32 %v327_v16, %v328_v24  ;;  %s906_s9 = sshra.s32 %s574_s7, 4  ;;  %s907_s9 = int_to_ptr.hbm [resolvable:$true] %s906_s9 }
  0x3b   : > { %v321_v23 = vsub.f32 %v319_v15, %v320_v20  ;;  %v354_v25 = vand.u32 4294901760, %v353_v21  ;;  %v305_v26 = vsub.f32 %v303_v18, %v304_v22  ;;  %v313_v31 = vsub.f32 %v311_v19, %v312_v27  ;;  %s908_s11 = scalar_lea.hbm %s907_s9, 56  ;;  %p913_p11 = scmp.lt.s32.totalorder %s907_s9, %s1204_s3 }
  0x3c   : > { %v330_v32 = vand.u32 4294901760, %v329_v30  ;;  %p909_p3 = scmp.ne.s32.totalorder %s907_s9, %s908_s11  ;;  %p914_p12 = scmp.lt.s32.totalorder %s912_s6, %s908_s11 }
  0x3d   : > { %v322_v28 = vand.u32 4294901760, %v321_v23  ;;  %713 = vmatpush.msra.mxu3 %v354_v25  ;;  %355 = vmatpush.msra.mxu1 %v354_v25  ;;  %v306_v29 = vand.u32 4294901760, %v305_v26  ;;  %v314_v33 = vand.u32 4294901760, %v313_v31 }
  0x3e   : > { %365 = vmatmul.f32.vlgmr.msra.gmra.mxu3 %v318_v8  ;;  %357 = vmatmul.f32.vlgmr.msra.gmra.mxu1 %v302_v13  ;;  %p910_p5 = pnand %p909_p3, %p1062_p8  ;;  %p915_p0 = por %p914_p12, %p913_p11 }
  0x3f   : > { %323 = vmatmul.f32.vlgmr.msra.gmra.mxu2 %v322_v28  ;;  %428 = vmatpush.msrb.mxu3 %v300_v3 }
  0x40   : > { %307 = vmatmul.f32.vlgmr.msra.gmra.mxu0 %v306_v29  ;;  %506 = vmatpush.msrb.mxu1 %v300_v3  ;;  %p911_p7 = pneg %p910_p5 }
  0x42   : > { %p916_p1 = pnand %p915_p0, %p911_p7 }
  0x46   : > { %369 = vmatmul.f32.gmra.mxu3 %v326_v9  ;;  %361 = vmatmul.f32.gmra.mxu1 %v310_v14 }
  0x47   : > { %331 = vmatmul.f32.gmra.mxu2 %v330_v32 }
  0x48   : > { %315 = vmatmul.f32.gmra.mxu0 %v314_v33 }
  0x4e   : > { %432 = vmatmul.f32.vlgmr.msrb.gmra.mxu3 %v304_v22  ;;  %508 = vmatmul.f32.vlgmr.msrb.gmra.mxu1 %v302_v13 }
  0x4f   : > { %393 = vmatmul.f32.vlgmr.msrb.gmra.mxu2 %v303_v18 }
  0x50   : > { %474 = vmatmul.f32.vlgmr.msrb.gmra.mxu0 %v302_v13 }
  0x56   : > { %438 = vmatmul.f32.gmra.mxu3 %v312_v27  ;;  %512 = vmatmul.f32.gmra.mxu1 %v310_v14 }
  0x57   : > { %398 = vmatmul.f32.gmra.mxu2 %v311_v19 }
  0x58   : > { %478 = vmatmul.f32.gmra.mxu0 %v310_v14 }
  0x5e   : > { %444 = vmatmul.f32.gmra.mxu3 %v320_v20  ;;  %516 = vmatmul.f32.gmra.mxu1 %v318_v8 }
  0x5f   : > { %403 = vmatmul.f32.gmra.mxu2 %v319_v15 }
  0x60   : > { %482 = vmatmul.f32.gmra.mxu0 %v318_v8 }
  0x66   : > { %450 = vmatmul.f32.gmra.mxu3 %v328_v24  ;;  %520 = vmatmul.f32.gmra.mxu1 %v326_v9 }
  0x67   : > { %408 = vmatmul.f32.gmra.mxu2 %v327_v16 }
  0x68   : > { %486 = vmatmul.f32.gmra.mxu0 %v326_v9 }
  0xbb   : > { %v358_v35 = vpop.f32.mrf.mxu1 }
  0xbd   : > { %v308_v34 = vpop.f32.mrf.mxu0 }
  0xbe   : > { %v359_v44 = vadd.f32 %v358_v35, %v308_v34 }
  0xc1   : > { %v366_v37 = vpop.f32.mrf.mxu3 }
  0xc2   : > { %v324_v36 = vpop.f32.mrf.mxu2 }
  0xc3   : > { %v362_v39 = vpop.f32.mrf.mxu1  ;;  %v367_v62 = vadd.f32 %v366_v37, %v324_v36 }
  0xc5   : > { %v316_v38 = vpop.f32.mrf.mxu0 }
  0xc6   : > { %v363_v54 = vadd.f32 %v362_v39, %v316_v38 }
  0xc9   : > { %v370_v41 = vpop.f32.mrf.mxu3 }
  0xca   : > { %v332_v40 = vpop.f32.mrf.mxu2 }
  0xcb   : > { %v509_v43 = vpop.f32.mrf.mxu1  ;;  %v371_v7 = vadd.f32 %v370_v41, %v332_v40 }
  0xcd   : > { %v475_v42 = vpop.f32.mrf.mxu0 }
  0xd1   : > { %v433_v46 = vpop.f32.mrf.mxu3 }
  0xd2   : > { %v394_v45 = vpop.f32.mrf.mxu2 }
  0xd3   : > { %v395_v47 = vadd.f32 %v394_v45, %v359_v44  ;;  %v513_v56 = vpop.f32.mrf.mxu1 }
  0xd5   : > { %v434_v51 = vadd.f32 %v433_v46, %v395_v47  ;;  %v479_v53 = vpop.f32.mrf.mxu0 }
  0xd7   : > { %v476_v52 = vadd.f32 %v475_v42, %v434_v51 }
  0xd9   : > { %v510_v55 = vadd.f32 %v509_v43, %v476_v52  ;;  %v439_v58 = vpop.f32.mrf.mxu3 }
  0xda   : > { %v399_v57 = vpop.f32.mrf.mxu2 }
  0xdb   : > { %v400_v59 = vadd.f32 %v399_v57, %v363_v54  ;;  %528 = vrot.lane.b32.xlu0 %v510_v55, %s987_s25  ;;  %v517_v4 = vpop.f32.mrf.mxu1 }
  0xdd   : > { %v440_v60 = vadd.f32 %v439_v58, %v400_v59  ;;  %v483_v0 = vpop.f32.mrf.mxu0 }
  0xdf   : > { %v480_v61 = vadd.f32 %v479_v53, %v440_v60 }
  0xe1   : > { %v514_v63 = vadd.f32 %v513_v56, %v480_v61  ;;  %v445_v2 = vpop.f32.mrf.mxu3 }
  0xe2   : > { %v404_v1 = vpop.f32.mrf.mxu2 }
  0xe3   : > { %v405_v3 = vadd.f32 %v404_v1, %v367_v62  ;;  %530 = vrot.lane.b32.xlu0 %v514_v63, %s987_s25  ;;  %v521_v14 = vpop.f32.mrf.mxu1 }
  0xe5   : > { %v446_v5 = vadd.f32 %v445_v2, %v405_v3  ;;  %v487_v12 = vpop.f32.mrf.mxu0 }
  0xe7   : > { %v484_v6 = vadd.f32 %v483_v0, %v446_v5 }
  0xe9   : > { %v518_v8 = vadd.f32 %v517_v4, %v484_v6  ;;  %v451_v10 = vpop.f32.mrf.mxu3 }
  0xea   : > { %v409_v9 = vpop.f32.mrf.mxu2 }
  0xeb   : > { %v410_v11 = vadd.f32 %v409_v9, %v371_v7  ;;  %532 = vrot.lane.b32.xlu1 %v518_v8, %s987_s25 }
  0xed   : > { %v452_v13 = vadd.f32 %v451_v10, %v410_v11 }
  0xef   : > { %v488_v15 = vadd.f32 %v487_v12, %v452_v13 }
  0xf1   : > { %v522_v16 = vadd.f32 %v521_v14, %v488_v15 }
  0xf3   : > { %534 = vrot.lane.b32.xlu1 %v522_v16, %s987_s25 }
 0x14d   : > { %v529_v17 = vpop.permute.xlu0 %528 }
 0x14e   : > { %v541_v18 = vsel %vm540_vm2, %v510_v55, %v529_v17 }
 0x14f   : > { %546 = vst.msk [vmem:[%s1142_s22] sm:$0xff] %vm545_vm1, %v541_v18 }
 0x155   : > { %v531_v19 = vpop.permute.xlu0 %530 }
 0x156   : > { %v542_v20 = vsel %vm540_vm2, %v514_v63, %v531_v19 }
 0x157   : > { %547 = vst.msk [vmem:[%s1142_s22 + $0x8] sm:$0xff] %vm545_vm1, %v542_v20 }
 0x15d   : > { %v533_v21 = vpop.permute.xlu1 %532 }
 0x15e   : > { %v543_v22 = vsel %vm540_vm2, %v518_v8, %v533_v21 }
 0x15f   : > { %548 = vst.msk [vmem:[%s1142_s22 + $0x10] sm:$0xff] %vm545_vm1, %v543_v22 }
 0x165   : > { %v535_v23 = vpop.permute.xlu1 %534 }
 0x166   : > { %v544_v24 = vsel %vm540_vm2, %v522_v16, %v535_v23 }
 0x167   : > { %549 = vst.msk [vmem:[%s1142_s22 + $0x18] sm:$0xff] %vm545_vm1, %v544_v24 }
 0x168   : > { %919 = shalt.err (!%p916_p1)
}
 0x169   : > { %s988_s21 = smov 128   ;;  %s989_s2 = smov 8  }
 0x16a   : > { %727 = dma.vmem_to_hbm [thread:$0]  (%p1062_p8), %s572_s10, 896, %s574_s7, %s558_s15, %s988_s21, %s988_s21, %s989_s2  }
 0x16b PF: > { %s1219_s28 = sld [smem:[#allocation13_spill]]  ;;  %p741_p2 = pnand %p697_p13, %p1066_p9 }
 0x16d   : > { %p742_p4 = pneg %p741_p2 }
 0x171   : > { %s588_s5 = sand.u32 1, %s1219_s28  }
 0x172   : > { %s589_s18 = scalar_lea.sflag [#allocation4], %s588_s5 }
 0x173   : > { %957 = dma.done.wait (%p742_p4), %s589_s18, 896  }
 0x174   : > { %959 = vsyncadd (%p742_p4), %s589_s18, 4294966400  ;;  %s22_s17 = sadd.s32 1, %s982_s17   ;;  %s1221_s23 = sld [smem:[#allocation15_spill]] }
 0x175   : > { %p19_p6 = scmp.ge.s32.totalorder %s22_s17, 4   ;;  %s1222_s12 = smov %s966_s13 }
 0x176   : > { %s1223_s13 = smov %s970_s14  ;;  %s1224_s14 = smov %s1104_s26 }
 0x177   : > { %s1225_s15 = smov %s978_s16  ;;  %21 = sbr.rel (!%p19_p6) target bundleno = 10 (0xa), region = 95 }
 0x17a   : > { %s1226_s16 = smov %s1221_s23 }
 0x17c   :  { %595 = vsyncpa [#allocation3], 1 }
 0x17d   :  { %597 = vsyncpa [#allocation3 + $0x1], 1 }
 0x17e   :  { %598 = vsyncpa [#allocation6], 1 }
 0x17f   :  { %600 = vsyncpa [#allocation6 + $0x1], 1 }
 0x180   :  { %601 = vsyncpa [#allocation4], 1 }
 0x181   :  { %603 = vsyncpa [#allocation4 + $0x1], 1 }

</bundles_post_ra>
